<compile_context>
chip_gen: v6e
topology: v6e:2x2x1
jax: 0.10.0
libtpu: 0.0.40
codegen_flags: <defaults>
</compile_context>

<pallas_src>
import jax
import jax.numpy as jnp
from jax.experimental import pallas as pl
from jax.experimental.pallas import tpu as pltpu


def _mlp_kernel(x_ref, w1_ref, w2_ref, b_ref, o_ref):
    """Fused 2-layer MLP on a sublane+lane packed batch slab.

    x_ref : VMEM (in_sz, 8, TL)    feature-major, batch packed into 8 x TL
    w1_ref: SMEM (in_sz, hid_sz)   = 0.5  * W1
    w2_ref: SMEM (hid_sz, out_sz)  = 0.25 * W2
    b_ref : SMEM (out_sz,)         = 0.25 * sum_h W2[h, :]
    o_ref : VMEM (out_sz, 8, TL)   lane-dense, full-sublane output
    """
    in_sz, hid_sz = w1_ref.shape
    _, out_sz = w2_ref.shape

    # Each feature slab is a full (8, TL) vreg-dense block.
    xs = [x_ref[k] for k in range(in_sz)]

    # Layer 1 (+ sigmoid folded into tanh): t_h = tanh(sum_k x_k * (0.5*W1[k,h]))
    th = []
    for h in range(hid_sz):
        z = xs[0] * w1_ref[0, h]
        for k in range(1, in_sz):
            z = z + xs[k] * w1_ref[k, h]
        th.append(jnp.tanh(z))

    # Layer 2 (+ final sigmoid): o_j = 0.5*tanh(sum_h t_h*(0.25*W2[h,j]) + b_j) + 0.5
    for j in range(out_sz):
        z = th[0] * w2_ref[0, j]
        for h in range(1, hid_sz):
            z = z + th[h] * w2_ref[h, j]
        z = z + b_ref[j]
        o_ref[j] = 0.5 * jnp.tanh(z) + 0.5


def _cdiv(a, b):
    return -(-a // b)


def _round_up(v, m):
    return _cdiv(v, m) * m


_MAX_LANES = 2048  # lanes per tile: 3x8x2048 f32 block = 192 KiB (x2 buffers) -> safe everywhere


def _tile_plan(n):
    """Pick (L, TL): total lanes (batch packed 8 x L) and the per-step lane tile."""
    L = _round_up(max(_cdiv(n, 8), 128), 128)
    if L <= 1024:
        return L, L                      # tiny batch: one grid step is fine
    steps = max(2, _cdiv(L, _MAX_LANES))  # >=2 steps so v7x's 2 TCs both get work
    tl = _round_up(_cdiv(L, steps), 128)
    return _round_up(L, tl), tl


@jax.jit
def neural_network_forward(x, w1, w2):
    """Forward pass o = sigmoid(sigmoid(X @ W1) @ W2) as a single fused Pallas kernel."""
    n, in_sz = x.shape
    in_sz2, hid_sz = w1.shape
    hid_sz2, out_sz = w2.shape
    assert in_sz == in_sz2 and hid_sz == hid_sz2

    L, tl = _tile_plan(n)
    npad = 8 * L

    # Host-side fold of the sigmoid affine (exact scaling in f32).
    w1f = w1.astype(jnp.float32)
    w2f = w2.astype(jnp.float32)
    w1_half = 0.5 * w1f
    w2_quarter = 0.25 * w2f
    b_quarter = 0.25 * jnp.sum(w2f, axis=0)          # (out_sz,)

    # Pack the batch across sublanes AND lanes: (in_sz, 8, L), batch b -> (b // L, b % L).
    x_t = x.astype(jnp.float32).T                    # (in_sz, n)
    x_p = jnp.pad(x_t, ((0, 0), (0, npad - n))).reshape(in_sz, 8, L)

    cost = pl.CostEstimate(
        flops=24 * npad,
        transcendentals=(hid_sz + out_sz) * npad,
        bytes_accessed=4 * (in_sz + out_sz) * npad,
    )

    out_p = pl.pallas_call(
        _mlp_kernel,
        out_shape=jax.ShapeDtypeStruct((out_sz, 8, L), jnp.float32),
        grid=(L // tl,),
        in_specs=[
            pl.BlockSpec((in_sz, 8, tl), lambda i: (0, 0, i)),     # packed X (VMEM)
            pl.BlockSpec(memory_space=pltpu.MemorySpace.SMEM),     # 0.5*W1 scalars
            pl.BlockSpec(memory_space=pltpu.MemorySpace.SMEM),     # 0.25*W2 scalars
            pl.BlockSpec(memory_space=pltpu.MemorySpace.SMEM),     # folded bias scalars
        ],
        out_specs=pl.BlockSpec((out_sz, 8, tl), lambda i: (0, 0, i)),
        compiler_params=pltpu.CompilerParams(
            dimension_semantics=("parallel",)),
        cost_estimate=cost,
    )(x_p, w1_half, w2_quarter, b_quarter)

    # Unpack: (out_sz, 8, L) -> (out_sz, 8*L) -> slice real batch -> (n, out_sz).
    return out_p.reshape(out_sz, npad)[:, :n].T


if __name__ == "__main__":
    key = jax.random.PRNGKey(0)
    k_x, k_w1, k_w2 = jax.random.split(key, 3)

    input_size, hidden_size, output_size = 3, 3, 1
    batch = 4

    # Deterministic "torch.randn"-style parameters (module __init__ shapes).
    W1 = jax.random.normal(k_w1, (input_size, hidden_size), dtype=jnp.float32)
    W2 = jax.random.normal(k_w2, (hidden_size, output_size), dtype=jnp.float32)

    # Input, scaled to [0,1] like X = X / X.max() in the tutorial.
    X = jax.random.uniform(k_x, (batch, input_size), dtype=jnp.float32)
    X = X / jnp.max(X)

    o = neural_network_forward(X, W1, W2)
    o = jax.block_until_ready(o)

    # Pure-JAX reference check of forward semantics.
    ref = jax.nn.sigmoid(jax.nn.sigmoid(X @ W1) @ W2)
    assert o.shape == (batch, output_size)
    assert jnp.allclose(o, ref, atol=1e-5, rtol=1e-5)

    # TODO(synk): backward()/train()/saveWeights()/predict() (manual SGD update,
    # torch.save, prints) are host-side training utilities, not implemented here.
    print("KERNEL_OK")
</pallas_src>

<mosaic_0001>
module attributes {stable_mosaic.version = 11 : i64} {
  func.func @_mlp_kernel(%arg0: i32, %arg1: memref<3x8x128xf32, #tpu.memory_space<vmem>>, %arg2: memref<3x3xf32, #tpu.memory_space<smem>>, %arg3: memref<3x1xf32, #tpu.memory_space<smem>>, %arg4: memref<1xf32, #tpu.memory_space<smem>>, %arg5: memref<1x8x128xf32, #tpu.memory_space<vmem>>) attributes {dimension_semantics = [#tpu.dimension_semantics<parallel>], iteration_bounds = array<i64: 1>, scalar_prefetch = 0 : i64, scratch_operands = 0 : i64, tpu.core_type = #tpu.core_type<tc>, window_params = [{transform_indices = @transform_0, window_bounds = array<i64: 3, 8, 128>}, {transform_indices = @transform_1, window_bounds = array<i64: 3, 3>}, {transform_indices = @transform_2, window_bounds = array<i64: 3, 1>}, {transform_indices = @transform_3, window_bounds = array<i64: 1>}, {transform_indices = @transform_4, window_bounds = array<i64: 1, 8, 128>}]} {
    %c0 = arith.constant 0 : index
    %c0_0 = arith.constant 0 : index
    %c0_1 = arith.constant 0 : index
    %0 = vector.load %arg1[%c0, %c0_0, %c0_1] : memref<3x8x128xf32, #tpu.memory_space<vmem>>, vector<1x8x128xf32>
    %1 = vector.shape_cast %0 : vector<1x8x128xf32> to vector<8x128xf32>
    %c1 = arith.constant 1 : index
    %c0_2 = arith.constant 0 : index
    %c0_3 = arith.constant 0 : index
    %2 = vector.load %arg1[%c1, %c0_2, %c0_3] : memref<3x8x128xf32, #tpu.memory_space<vmem>>, vector<1x8x128xf32>
    %3 = vector.shape_cast %2 : vector<1x8x128xf32> to vector<8x128xf32>
    %c2 = arith.constant 2 : index
    %c0_4 = arith.constant 0 : index
    %c0_5 = arith.constant 0 : index
    %4 = vector.load %arg1[%c2, %c0_4, %c0_5] : memref<3x8x128xf32, #tpu.memory_space<vmem>>, vector<1x8x128xf32>
    %5 = vector.shape_cast %4 : vector<1x8x128xf32> to vector<8x128xf32>
    %c0_6 = arith.constant 0 : index
    %c0_7 = arith.constant 0 : index
    %6 = memref.load %arg2[%c0_6, %c0_7] : memref<3x3xf32, #tpu.memory_space<smem>>
    %7 = vector.broadcast %6 : f32 to vector<8x128xf32>
    %8 = arith.mulf %1, %7 : vector<8x128xf32>
    %c1_8 = arith.constant 1 : index
    %c0_9 = arith.constant 0 : index
    %9 = memref.load %arg2[%c1_8, %c0_9] : memref<3x3xf32, #tpu.memory_space<smem>>
    %10 = vector.broadcast %9 : f32 to vector<8x128xf32>
    %11 = arith.mulf %3, %10 : vector<8x128xf32>
    %12 = arith.addf %8, %11 : vector<8x128xf32>
    %c2_10 = arith.constant 2 : index
    %c0_11 = arith.constant 0 : index
    %13 = memref.load %arg2[%c2_10, %c0_11] : memref<3x3xf32, #tpu.memory_space<smem>>
    %14 = vector.broadcast %13 : f32 to vector<8x128xf32>
    %15 = arith.mulf %5, %14 : vector<8x128xf32>
    %16 = arith.addf %12, %15 : vector<8x128xf32>
    %17 = math.tanh %16 : vector<8x128xf32>
    %c0_12 = arith.constant 0 : index
    %c1_13 = arith.constant 1 : index
    %18 = memref.load %arg2[%c0_12, %c1_13] : memref<3x3xf32, #tpu.memory_space<smem>>
    %19 = vector.broadcast %18 : f32 to vector<8x128xf32>
    %20 = arith.mulf %1, %19 : vector<8x128xf32>
    %c1_14 = arith.constant 1 : index
    %c1_15 = arith.constant 1 : index
    %21 = memref.load %arg2[%c1_14, %c1_15] : memref<3x3xf32, #tpu.memory_space<smem>>
    %22 = vector.broadcast %21 : f32 to vector<8x128xf32>
    %23 = arith.mulf %3, %22 : vector<8x128xf32>
    %24 = arith.addf %20, %23 : vector<8x128xf32>
    %c2_16 = arith.constant 2 : index
    %c1_17 = arith.constant 1 : index
    %25 = memref.load %arg2[%c2_16, %c1_17] : memref<3x3xf32, #tpu.memory_space<smem>>
    %26 = vector.broadcast %25 : f32 to vector<8x128xf32>
    %27 = arith.mulf %5, %26 : vector<8x128xf32>
    %28 = arith.addf %24, %27 : vector<8x128xf32>
    %29 = math.tanh %28 : vector<8x128xf32>
    %c0_18 = arith.constant 0 : index
    %c2_19 = arith.constant 2 : index
    %30 = memref.load %arg2[%c0_18, %c2_19] : memref<3x3xf32, #tpu.memory_space<smem>>
    %31 = vector.broadcast %30 : f32 to vector<8x128xf32>
    %32 = arith.mulf %1, %31 : vector<8x128xf32>
    %c1_20 = arith.constant 1 : index
    %c2_21 = arith.constant 2 : index
    %33 = memref.load %arg2[%c1_20, %c2_21] : memref<3x3xf32, #tpu.memory_space<smem>>
    %34 = vector.broadcast %33 : f32 to vector<8x128xf32>
    %35 = arith.mulf %3, %34 : vector<8x128xf32>
    %36 = arith.addf %32, %35 : vector<8x128xf32>
    %c2_22 = arith.constant 2 : index
    %c2_23 = arith.constant 2 : index
    %37 = memref.load %arg2[%c2_22, %c2_23] : memref<3x3xf32, #tpu.memory_space<smem>>
    %38 = vector.broadcast %37 : f32 to vector<8x128xf32>
    %39 = arith.mulf %5, %38 : vector<8x128xf32>
    %40 = arith.addf %36, %39 : vector<8x128xf32>
    %41 = math.tanh %40 : vector<8x128xf32>
    %c0_24 = arith.constant 0 : index
    %c0_25 = arith.constant 0 : index
    %42 = memref.load %arg3[%c0_24, %c0_25] : memref<3x1xf32, #tpu.memory_space<smem>>
    %43 = vector.broadcast %42 : f32 to vector<8x128xf32>
    %44 = arith.mulf %17, %43 : vector<8x128xf32>
    %c1_26 = arith.constant 1 : index
    %c0_27 = arith.constant 0 : index
    %45 = memref.load %arg3[%c1_26, %c0_27] : memref<3x1xf32, #tpu.memory_space<smem>>
    %46 = vector.broadcast %45 : f32 to vector<8x128xf32>
    %47 = arith.mulf %29, %46 : vector<8x128xf32>
    %48 = arith.addf %44, %47 : vector<8x128xf32>
    %c2_28 = arith.constant 2 : index
    %c0_29 = arith.constant 0 : index
    %49 = memref.load %arg3[%c2_28, %c0_29] : memref<3x1xf32, #tpu.memory_space<smem>>
    %50 = vector.broadcast %49 : f32 to vector<8x128xf32>
    %51 = arith.mulf %41, %50 : vector<8x128xf32>
    %52 = arith.addf %48, %51 : vector<8x128xf32>
    %c0_30 = arith.constant 0 : index
    %53 = memref.load %arg4[%c0_30] : memref<1xf32, #tpu.memory_space<smem>>
    %54 = vector.broadcast %53 : f32 to vector<8x128xf32>
    %55 = arith.addf %52, %54 : vector<8x128xf32>
    %56 = math.tanh %55 : vector<8x128xf32>
    %cst = arith.constant 5.000000e-01 : f32
    %57 = vector.broadcast %cst : f32 to vector<8x128xf32>
    %58 = arith.mulf %57, %56 : vector<8x128xf32>
    %cst_31 = arith.constant 5.000000e-01 : f32
    %59 = vector.broadcast %cst_31 : f32 to vector<8x128xf32>
    %60 = arith.addf %58, %59 : vector<8x128xf32>
    %c0_32 = arith.constant 0 : index
    %c0_33 = arith.constant 0 : index
    %c0_34 = arith.constant 0 : index
    %61 = vector.load %arg5[%c0_32, %c0_33, %c0_34] : memref<1x8x128xf32, #tpu.memory_space<vmem>>, vector<1x8x128xf32>
    %62 = vector.shape_cast %61 : vector<1x8x128xf32> to vector<8x128xf32>
    %63 = vector.shape_cast %60 : vector<8x128xf32> to vector<1x8x128xf32>
    tpu.vector_store %arg5[%c0_32, %c0_33, %c0_34], %63 {strides = array<i32>} : memref<1x8x128xf32, #tpu.memory_space<vmem>>, vector<1x8x128xf32>,
    return
  }
  func.func @transform_0(%arg0: i32) -> (i32, i32, i32) {
    %c0_i32 = arith.constant 0 : i32
    %c0_i32_0 = arith.constant 0 : i32
    %c0_i32_1 = arith.constant 0 : i32
    return %c0_i32, %c0_i32_0, %arg0 : i32, i32, i32
  }
  func.func @transform_1(%arg0: i32) -> (i32, i32) {
    %c0_i32 = arith.constant 0 : i32
    %c0_i32_0 = arith.constant 0 : i32
    %c0_i32_1 = arith.constant 0 : i32
    return %c0_i32, %c0_i32_0 : i32, i32
  }
  func.func @transform_2(%arg0: i32) -> (i32, i32) {
    %c0_i32 = arith.constant 0 : i32
    %c0_i32_0 = arith.constant 0 : i32
    %c0_i32_1 = arith.constant 0 : i32
    return %c0_i32, %c0_i32_0 : i32, i32
  }
  func.func @transform_3(%arg0: i32) -> i32 {
    %c0_i32 = arith.constant 0 : i32
    %c0_i32_0 = arith.constant 0 : i32
    return %c0_i32 : i32
  }
  func.func @transform_4(%arg0: i32) -> (i32, i32, i32) {
    %c0_i32 = arith.constant 0 : i32
    %c0_i32_0 = arith.constant 0 : i32
    %c0_i32_1 = arith.constant 0 : i32
    return %c0_i32, %c0_i32_0, %arg0 : i32, i32, i32
  }
}

</mosaic_0001>

<bundles_post_ra>
// kernel: neural_network_forward.1
= control target key start
LH: loop header
LB: loop body
LE: loop exit
PB: predicated region body
PF: predicated region fallthrough
CT: control target
= control target key end

     0   :  { %10 = vsyncpa [#allocation4], 0  ;;  %s206_s0 = inlined_call_operand.vmem [shape: f32[3,8,128], index: 0, kind: input, shape index: {}]   ;;  %s207_s1 = inlined_call_operand.vmem [shape: f32[3,3], index: 1, kind: input, shape index: {}]   ;;  %s208_s2 = inlined_call_operand.vmem [shape: f32[3,1], index: 2, kind: input, shape index: {}]   ;;  %s209_s3 = inlined_call_operand.<no memory space> [shape: f32[1], index: 3, kind: input, shape index: {}]   ;;  %s210_s4 = inlined_call_operand.vmem [shape: f32[1,8,128], index: 4, kind: output, shape index: {}]  }
   0x1   :  { %s20_s17 = sshll.u32 %s207_s1, 4  ;;  %s21_s17 = int_to_ptr.vmem [resolvable:$true] %s20_s17 }
   0x2   :  { %11 = vsyncpa [#allocation6], 0  ;;  %s30_s20 = sshll.u32 %s208_s2, 4  ;;  %s130_s21 = scalar_lea.vmem %s21_s17, 64  ;;  %s31_s20 = int_to_ptr.vmem [resolvable:$true] %s30_s20 }
   0x3   :  { %p131_p0 = scmp.ne.s32.totalorder %s21_s17, %s130_s21  ;;  %p135_p1 = scmp.lt.s32.totalorder %s21_s17, %s21_s17 }
   0x4   :  { %p136_p2 = scmp.lt.s32.totalorder %s130_s21, %s130_s21 }
   0x6   :  { %p137_p3 = por %p136_p2, %p135_p1 }
   0x8   :  { %p138_p4 = pnand %p137_p3, %p131_p0 }
   0xa   :  { %141 = shalt.err (!%p138_p4)
}
   0xb   :  { %s158_s22 = smov [#allocation3]   ;;  %s142_s23 = scalar_lea.vmem %s31_s20, 64 }
   0xc   :  { %23 = dma.vmem_to_smem %s21_s17, 64, %s158_s22, [#allocation4]  }
   0xd   :  { %p143_p5 = scmp.ne.s32.totalorder %s31_s20, %s142_s23  ;;  %p147_p6 = scmp.lt.s32.totalorder %s31_s20, %s31_s20 }
   0xe   :  { %p148_p7 = scmp.lt.s32.totalorder %s142_s23, %s142_s23 }
  0x10   :  { %p149_p8 = por %p148_p7, %p147_p6 }
  0x12   :  { %p150_p9 = pnand %p149_p8, %p143_p5 }
  0x14   :  { %153 = shalt.err (!%p150_p9)
}
  0x15   :  { %s159_s1 = smov [#allocation5]  }
  0x16   :  { %33 = dma.vmem_to_smem %s31_s20, 64, %s159_s1, [#allocation6]  }
  0x17   :  { %154 = dma.done.wait [#allocation4], 64  }
  0x18   :  { %155 = vsyncadd [#allocation4], 4294967232 }
  0x19   :  { %156 = dma.done.wait [#allocation6], 64  }
  0x1a   :  { %157 = vsyncadd [#allocation6], 4294967232 }
  0x1b   :  { %42 = sfence }
  0x1c   :  { %s48_s2 = sld [smem:[#allocation3]]  ;;  %v43_v0 = vld [vmem:[%s206_s0] sm:$0xff]  ;;  %v108_v1 = vld [vmem:[%s206_s0 + $0x8] sm:$0xff]  ;;  %v109_v2 = vld [vmem:[%s206_s0 + $0x10] sm:$0xff]  ;;  %v96_v37 = vstv %s209_s3 }
  0x1d   :  { %s110_s24 = sld [smem:[#allocation3 + $0x80]] }
  0x1e   :  { %s111_s25 = sld [smem:[#allocation3 + $0x100]] }
  0x1f   :  { %s112_s26 = sld [smem:[#allocation3 + $0x1]] }
  0x20   :  { %s113_s29 = sld [smem:[#allocation3 + $0x81]] }
  0x21   :  { %s114_s6 = sld [smem:[#allocation3 + $0x101]] }
  0x22   :  { %v49_v3 = vstv %s48_s2  ;;  %s115_s9 = sld [smem:[#allocation3 + $0x2]] }
  0x23   :  { %v50_v4 = vmul.f32 %v49_v3, %v43_v0  ;;  %v52_v5 = vstv %s110_s24  ;;  %s116_s10 = sld [smem:[#allocation3 + $0x82]] }
  0x24   :  { %v53_v6 = vmul.f32 %v108_v1, %v52_v5  ;;  %v56_v7 = vstv %s111_s25  ;;  %s117_s11 = sld [smem:[#allocation3 + $0x102]] }
  0x25   :  { %v57_v8 = vmul.f32 %v109_v2, %v56_v7  ;;  %v61_v9 = vstv %s112_s26  ;;  %s84_s0 = sld [smem:[#allocation5]] }
  0x26   :  { %v54_v10 = vadd.f32 %v53_v6, %v50_v4  ;;  %v62_v11 = vmul.f32 %v61_v9, %v43_v0  ;;  %v64_v12 = vstv %s113_s29  ;;  %s118_s12 = sld [smem:[#allocation5 + $0x80]] }
  0x27   :  { %v65_v13 = vmul.f32 %v108_v1, %v64_v12  ;;  %v68_v14 = vstv %s114_s6  ;;  %s119_s13 = sld [smem:[#allocation5 + $0x100]] }
  0x28   :  { %v58_v15 = vadd.f32 %v57_v8, %v54_v10  ;;  %v69_v16 = vmul.f32 %v109_v2, %v68_v14  ;;  %v73_v17 = vstv %s115_s9 }
  0x29   :  { %v66_v18 = vadd.f32 %v65_v13, %v62_v11  ;;  %v74_v19 = vmul.f32 %v73_v17, %v43_v0  ;;  %v76_v20 = vstv %s116_s10 }
  0x2a   :  { %122 = vtanh.f32 %v58_v15  ;;  %v77_v21 = vmul.f32 %v108_v1, %v76_v20  ;;  %v80_v22 = vstv %s117_s11 }
  0x2b   :  { %v70_v23 = vadd.f32 %v69_v16, %v66_v18  ;;  %v81_v24 = vmul.f32 %v109_v2, %v80_v22  ;;  %v85_v27 = vstv %s84_s0 }
  0x2c   :  { %v78_v25 = vadd.f32 %v77_v21, %v74_v19  ;;  %v88_v29 = vstv %s118_s12 }
  0x2d   :  { %124 = vtanh.f32 %v70_v23  ;;  %v92_v33 = vstv %s119_s13 }
  0x2e   :  { %v82_v26 = vadd.f32 %v81_v24, %v78_v25 }
  0x30   :  { %126 = vtanh.f32 %v82_v26 }
  0x37   :  { %v123_v28 = vpop.eup %122 }
  0x38   :  { %v86_v30 = vmul.f32 %v123_v28, %v85_v27 }
  0x3a   :  { %v125_v31 = vpop.eup %124 }
  0x3b   :  { %v89_v32 = vmul.f32 %v125_v31, %v88_v29 }
  0x3d   :  { %v127_v34 = vpop.eup %126  ;;  %v90_v35 = vadd.f32 %v89_v32, %v86_v30 }
  0x3e   :  { %v93_v36 = vmul.f32 %v127_v34, %v92_v33 }
  0x40   :  { %v94_v38 = vadd.f32 %v93_v36, %v90_v35 }
  0x42   :  { %v97_v39 = vadd.f32 %v96_v37, %v94_v38 }
  0x44   :  { %128 = vtanh.f32 %v97_v39 }
  0x51   :  { %v129_v40 = vpop.eup %128 }
  0x52   :  { %v99_v41 = vmul.f32 0.5, %v129_v40 }
  0x54   :  { %v100_v42 = vadd.f32 0.5, %v99_v41 }
  0x56   :  { %101 = vst [vmem:[%s210_s4] sm:$0xff] %v100_v42 }
  0x57   :  { %106 = vsyncpa [#allocation4], 1 }
  0x58   :  { %107 = vsyncpa [#allocation6], 1 }

</bundles_post_ra>
